<compile_context>
chip_gen: v7x
topology: tpu7x:2x2x1
jax: 0.10.0
libtpu: 0.0.40
codegen_flags: <defaults>
</compile_context>

<pallas_src>
import functools

import jax
import jax.numpy as jnp
from jax.experimental import pallas as pl
from jax.experimental.pallas import tpu as pltpu

LN_EPS = 1e-5  # nn.LayerNorm default
LANE = 128
SUBLANE = 8
N_VEC_ROWS = 8  # 7 small vectors, rounded up to a full sublane tile


def _round_up(x, m):
    return (x + m - 1) // m * m


def _masked_layernorm(x, gamma, beta, n_valid):
    """LayerNorm over the last axis using only the first n_valid lanes.

    Assumes pad lanes of x are exactly 0 and gamma/beta pad lanes are 0, so
    pad lanes of the result are 0 (safe for the following matmul)."""
    lanes = x.shape[-1]
    if n_valid == lanes:
        mean = jnp.mean(x, axis=-1, keepdims=True)
        diff = x - mean
        var = jnp.mean(diff * diff, axis=-1, keepdims=True)
    else:
        lane_id = jax.lax.broadcasted_iota(jnp.int32, x.shape, x.ndim - 1)
        mask = lane_id < n_valid
        inv_n = 1.0 / float(n_valid)
        mean = jnp.sum(jnp.where(mask, x, 0.0), axis=-1, keepdims=True) * inv_n
        diff = jnp.where(mask, x - mean, 0.0)
        var = jnp.sum(diff * diff, axis=-1, keepdims=True) * inv_n
    inv = jax.lax.rsqrt(var + LN_EPS)
    return (x - mean) * inv * gamma + beta


def actor_kernel(x_ref, p_ref, o_ref, *, d_in_p, h1p, h2p, ap, h1_true, h2_true):
    # Static row offsets inside the packed parameter slab.  All offsets are
    # multiples of 8 sublanes and all column widths multiples of 128 lanes,
    # so every slice below is a tile-aligned (unmasked) load.
    r1 = d_in_p
    r2 = r1 + h1p
    r3 = r2 + h2p

    x = x_ref[...]

    w1 = p_ref[0:r1, 0:h1p]
    w2 = p_ref[r1:r2, 0:h2p]
    w3 = p_ref[r2:r3, 0:ap]
    b1 = p_ref[r3 + 0:r3 + 1, 0:h1p]
    g1 = p_ref[r3 + 1:r3 + 2, 0:h1p]
    be1 = p_ref[r3 + 2:r3 + 3, 0:h1p]
    b2 = p_ref[r3 + 3:r3 + 4, 0:h2p]
    g2 = p_ref[r3 + 4:r3 + 5, 0:h2p]
    be2 = p_ref[r3 + 5:r3 + 6, 0:h2p]
    b3 = p_ref[r3 + 6:r3 + 7, 0:ap]

    # fc1 -> LayerNorm -> ReLU
    h1 = jnp.dot(x, w1, preferred_element_type=jnp.float32) + b1
    h1 = _masked_layernorm(h1, g1, be1, h1_true)
    h1 = jnp.maximum(h1, 0.0)

    # fc2 -> LayerNorm -> ReLU
    h2 = jnp.dot(h1, w2, preferred_element_type=jnp.float32) + b2
    h2 = _masked_layernorm(h2, g2, be2, h2_true)
    h2 = jnp.maximum(h2, 0.0)

    # mu -> tanh (pad lanes stay exactly 0: zero weight cols, zero bias, tanh(0)=0)
    out = jnp.dot(h2, w3, preferred_element_type=jnp.float32) + b3
    o_ref[...] = jnp.tanh(out).astype(o_ref.dtype)


@functools.partial(jax.jit, static_argnames=("h_dims", "n_actions"))
def actor_forward(state, param_slab, *, h_dims, n_actions):
    """Run the fused actor forward. `param_slab` comes from pack_params()."""
    B, d_in = state.shape
    d_in_p = _round_up(d_in, SUBLANE)
    h1p = _round_up(h_dims[0], LANE)
    h2p = _round_up(h_dims[1], LANE)
    ap = _round_up(n_actions, LANE)

    R = d_in_p + h1p + h2p + N_VEC_ROWS
    C = max(h1p, h2p, ap)
    assert param_slab.shape == (R, C), "param_slab does not match model sizes"

    # Batch tile: multiple of 8 sublanes, capped at 128 rows (VMEM-friendly).
    TB = min(128, _round_up(B, SUBLANE))
    B_pad = _round_up(B, TB)
    if B_pad != B or d_in_p != d_in:
        state = jnp.pad(state, ((0, B_pad - B), (0, d_in_p - d_in)))

    kernel = functools.partial(
        actor_kernel, d_in_p=d_in_p, h1p=h1p, h2p=h2p, ap=ap,
        h1_true=h_dims[0], h2_true=h_dims[1])

    out = pl.pallas_call(
        kernel,
        out_shape=jax.ShapeDtypeStruct((B_pad, ap), jnp.float32),
        grid=(B_pad // TB,),
        in_specs=[
            pl.BlockSpec((TB, d_in_p), lambda i: (i, 0)),  # state: walks batch
            pl.BlockSpec((R, C), lambda i: (0, 0)),        # params: VMEM-resident
        ],
        out_specs=pl.BlockSpec((TB, ap), lambda i: (i, 0)),
        compiler_params=pltpu.CompilerParams(
            dimension_semantics=("parallel",),
        ),
    )(state, param_slab)

    return out[:B, :n_actions]


def init_params(key, in_dim, h_dims, n_actions):
    """Deterministic init mirroring ActorNetwork.__init__ (uniform ranges).

    Weights are stored [in_features, out_features] (pre-transposed vs torch)."""
    k1, k2, k3, k4, k5, k6 = jax.random.split(key, 6)
    # PyTorch code uses weight.size()[0] == out_features for the bound.
    f1 = 1.0 / jnp.sqrt(h_dims[0])
    f2 = 1.0 / jnp.sqrt(h_dims[1])
    f3 = 0.003

    w1 = jax.random.uniform(k1, (in_dim, h_dims[0]), jnp.float32, -f1, f1)
    b1 = jax.random.uniform(k2, (1, h_dims[0]), jnp.float32, -f1, f1)
    w2 = jax.random.uniform(k3, (h_dims[0], h_dims[1]), jnp.float32, -f2, f2)
    b2 = jax.random.uniform(k4, (1, h_dims[1]), jnp.float32, -f2, f2)
    w3 = jax.random.uniform(k5, (h_dims[1], n_actions), jnp.float32, -f3, f3)
    b3 = jax.random.uniform(k6, (1, n_actions), jnp.float32, -f3, f3)

    # LayerNorm affine params: default init (ones / zeros).
    g1 = jnp.ones((1, h_dims[0]), jnp.float32)
    be1 = jnp.zeros((1, h_dims[0]), jnp.float32)
    g2 = jnp.ones((1, h_dims[1]), jnp.float32)
    be2 = jnp.zeros((1, h_dims[1]), jnp.float32)

    return (w1, b1, g1, be1, w2, b2, g2, be2, w3, b3)


def pack_params(params):
    """Pack all weights + small vectors into ONE tile-aligned f32 slab.

    Row layout (row offsets multiples of 8, column widths multiples of 128):
      [0, d_in_p)              : fc1 weight (in_dim, h1), zero-padded
      [d_in_p, d_in_p+h1p)     : fc2 weight (h1, h2),     zero-padded
      [.., ..+h2p)             : mu  weight (h2, a),      zero-padded
      last 8 rows              : b1, g1, be1, b2, g2, be2, b3, 0
    Gamma/beta pads are zero, so padded LayerNorm lanes come out exactly 0."""
    (w1, b1, g1, be1, w2, b2, g2, be2, w3, b3) = params
    d_in, h1 = w1.shape
    h2 = w2.shape[1]
    a = w3.shape[1]
    d_in_p = _round_up(d_in, SUBLANE)
    h1p = _round_up(h1, LANE)
    h2p = _round_up(h2, LANE)
    ap = _round_up(a, LANE)
    C = max(h1p, h2p, ap)

    def pad2(w, rows, cols):
        w = w.astype(jnp.float32)
        return jnp.pad(w, ((0, rows - w.shape[0]), (0, cols - w.shape[1])))

    def row(v):
        v = jnp.reshape(v, (-1,)).astype(jnp.float32)
        return jnp.pad(v, (0, C - v.shape[0]))

    rows = [row(b1), row(g1), row(be1), row(b2), row(g2), row(be2), row(b3)]
    rows += [jnp.zeros((C,), jnp.float32)] * (N_VEC_ROWS - len(rows))
    vec = jnp.stack(rows, axis=0)

    slab = jnp.concatenate(
        [pad2(w1, d_in_p, C), pad2(w2, h1p, C), pad2(w3, h2p, C), vec], axis=0)
    return slab


def _layernorm_ref(x, gamma, beta):
    mean = jnp.mean(x, axis=-1, keepdims=True)
    var = jnp.mean(jnp.square(x - mean), axis=-1, keepdims=True)
    inv = jax.lax.rsqrt(var + LN_EPS)
    return (x - mean) * inv * gamma + beta


def actor_forward_ref(state, params):
    """Plain-JAX reference (unpadded) for correctness checking."""
    (w1, b1, g1, be1, w2, b2, g2, be2, w3, b3) = params
    h1 = jnp.maximum(_layernorm_ref(state @ w1 + b1, g1, be1), 0.0)
    h2 = jnp.maximum(_layernorm_ref(h1 @ w2 + b2, g2, be2), 0.0)
    return jnp.tanh(h2 @ w3 + b3)


if __name__ == "__main__":
    # Small shapes consistent with the module: in_dims=(16,), h_dims=(32, 32),
    # n_actions=4, batch=8.
    B, IN_DIM, H_DIMS, N_ACTIONS = 8, 16, (32, 32), 4

    key = jax.random.PRNGKey(0)
    k_params, k_state = jax.random.split(key)
    params = init_params(k_params, IN_DIM, H_DIMS, N_ACTIONS)
    slab = pack_params(params)
    state = jax.random.normal(k_state, (B, IN_DIM), jnp.float32)

    out = actor_forward(state, slab, h_dims=H_DIMS, n_actions=N_ACTIONS)
    out = jax.block_until_ready(out)
    ref = actor_forward_ref(state, params)
    assert out.shape == (B, N_ACTIONS)
    assert jnp.allclose(out, ref, atol=1e-5, rtol=1e-5), "mismatch vs reference (B=8)"

    # Exercise the multi-tile batch grid + row-padding path (B not aligned).
    B2 = 200
    state2 = jax.random.normal(jax.random.PRNGKey(1), (B2, IN_DIM), jnp.float32)
    out2 = jax.block_until_ready(
        actor_forward(state2, slab, h_dims=H_DIMS, n_actions=N_ACTIONS)
    )
    ref2 = actor_forward_ref(state2, params)
    assert out2.shape == (B2, N_ACTIONS)
    assert jnp.allclose(out2, ref2, atol=1e-5, rtol=1e-5), "mismatch vs reference (B=200)"

    print("KERNEL_OK")
</pallas_src>

<mosaic_0001>
module attributes {stable_mosaic.version = 11 : i64} {
  func.func @actor_kernel(%arg0: i32, %arg1: memref<8x16xf32, #tpu.memory_space<vmem>>, %arg2: memref<280x128xf32, #tpu.memory_space<vmem>>, %arg3: memref<8x128xf32, #tpu.memory_space<vmem>>) attributes {dimension_semantics = [#tpu.dimension_semantics<parallel>], iteration_bounds = array<i64: 1>, scalar_prefetch = 0 : i64, scratch_operands = 0 : i64, tpu.core_type = #tpu.core_type<tc>, window_params = [{transform_indices = @transform_0, window_bounds = array<i64: 8, 16>}, {pipeline_mode = #tpu.pipeline_mode<synchronous>, transform_indices = @transform_1, window_bounds = array<i64: 280, 128>}, {transform_indices = @transform_2, window_bounds = array<i64: 8, 128>}]} {
    %c0 = arith.constant 0 : index
    %c0_0 = arith.constant 0 : index
    %0 = vector.load %arg1[%c0, %c0_0] : memref<8x16xf32, #tpu.memory_space<vmem>>, vector<8x16xf32>
    %c0_1 = arith.constant 0 : index
    %c0_2 = arith.constant 0 : index
    %1 = vector.load %arg2[%c0_1, %c0_2] : memref<280x128xf32, #tpu.memory_space<vmem>>, vector<16x128xf32>
    %c16 = arith.constant 16 : index
    %c0_3 = arith.constant 0 : index
    %2 = vector.load %arg2[%c16, %c0_3] : memref<280x128xf32, #tpu.memory_space<vmem>>, vector<128x128xf32>
    %c144 = arith.constant 144 : index
    %c0_4 = arith.constant 0 : index
    %3 = vector.load %arg2[%c144, %c0_4] : memref<280x128xf32, #tpu.memory_space<vmem>>, vector<128x128xf32>
    %c272 = arith.constant 272 : index
    %c0_5 = arith.constant 0 : index
    %4 = vector.load %arg2[%c272, %c0_5] : memref<280x128xf32, #tpu.memory_space<vmem>>, vector<1x128xf32>
    %c273 = arith.constant 273 : index
    %c0_6 = arith.constant 0 : index
    %5 = vector.load %arg2[%c273, %c0_6] : memref<280x128xf32, #tpu.memory_space<vmem>>, vector<1x128xf32>
    %c274 = arith.constant 274 : index
    %c0_7 = arith.constant 0 : index
    %6 = vector.load %arg2[%c274, %c0_7] : memref<280x128xf32, #tpu.memory_space<vmem>>, vector<1x128xf32>
    %c275 = arith.constant 275 : index
    %c0_8 = arith.constant 0 : index
    %7 = vector.load %arg2[%c275, %c0_8] : memref<280x128xf32, #tpu.memory_space<vmem>>, vector<1x128xf32>
    %c276 = arith.constant 276 : index
    %c0_9 = arith.constant 0 : index
    %8 = vector.load %arg2[%c276, %c0_9] : memref<280x128xf32, #tpu.memory_space<vmem>>, vector<1x128xf32>
    %c277 = arith.constant 277 : index
    %c0_10 = arith.constant 0 : index
    %9 = vector.load %arg2[%c277, %c0_10] : memref<280x128xf32, #tpu.memory_space<vmem>>, vector<1x128xf32>
    %c278 = arith.constant 278 : index
    %c0_11 = arith.constant 0 : index
    %10 = vector.load %arg2[%c278, %c0_11] : memref<280x128xf32, #tpu.memory_space<vmem>>, vector<1x128xf32>
    %cst = arith.constant dense<0.000000e+00> : vector<8x128xf32>
    %11 = tpu.matmul %0, %1, %cst {dimension_numbers = #tpu.dot_dimension_numbers<[1], [0], [0], [1], [0, 0, 1, 1], [], []>} : vector<8x16xf32>, vector<16x128xf32>, vector<8x128xf32> -> vector<8x128xf32>
    %12 = vector.broadcast %4 : vector<1x128xf32> to vector<8x128xf32>
    %13 = arith.addf %11, %12 : vector<8x128xf32>
    %14 = tpu.iota {dimensions = array<i32: 1>} : vector<8x128xi32>
    %c32_i32 = arith.constant 32 : i32
    %15 = vector.broadcast %c32_i32 : i32 to vector<8x128xi32>
    %16 = arith.cmpi slt, %14, %15 : vector<8x128xi32>
    %cst_12 = arith.constant 0.000000e+00 : f32
    %17 = vector.broadcast %cst_12 : f32 to vector<8x128xf32>
    %18 = arith.select %16, %13, %17 : vector<8x128xi1>, vector<8x128xf32>
    %cst_13 = arith.constant dense<0.000000e+00> : vector<8xf32>
    %19 = vector.multi_reduction <add>, %18, %cst_13 [1] : vector<8x128xf32> to vector<8xf32>
    %20 = vector.shape_cast %19 : vector<8xf32> to vector<8x1xf32>
    %cst_14 = arith.constant 3.125000e-02 : f32
    %21 = vector.broadcast %cst_14 : f32 to vector<8x1xf32>
    %22 = arith.mulf %20, %21 : vector<8x1xf32>
    %23 = vector.broadcast %22 : vector<8x1xf32> to vector<8x128xf32>
    %24 = arith.subf %13, %23 : vector<8x128xf32>
    %cst_15 = arith.constant 0.000000e+00 : f32
    %25 = vector.broadcast %cst_15 : f32 to vector<8x128xf32>
    %26 = arith.select %16, %24, %25 : vector<8x128xi1>, vector<8x128xf32>
    %27 = arith.mulf %26, %26 : vector<8x128xf32>
    %cst_16 = arith.constant dense<0.000000e+00> : vector<8xf32>
    %28 = vector.multi_reduction <add>, %27, %cst_16 [1] : vector<8x128xf32> to vector<8xf32>
    %29 = vector.shape_cast %28 : vector<8xf32> to vector<8x1xf32>
    %cst_17 = arith.constant 3.125000e-02 : f32
    %30 = vector.broadcast %cst_17 : f32 to vector<8x1xf32>
    %31 = arith.mulf %29, %30 : vector<8x1xf32>
    %cst_18 = arith.constant 9.99999974E-6 : f32
    %32 = vector.broadcast %cst_18 : f32 to vector<8x1xf32>
    %33 = arith.addf %31, %32 : vector<8x1xf32>
    %34 = math.rsqrt %33 : vector<8x1xf32>
    %35 = vector.broadcast %22 : vector<8x1xf32> to vector<8x128xf32>
    %36 = arith.subf %13, %35 : vector<8x128xf32>
    %37 = vector.broadcast %34 : vector<8x1xf32> to vector<8x128xf32>
    %38 = arith.mulf %36, %37 : vector<8x128xf32>
    %39 = vector.broadcast %5 : vector<1x128xf32> to vector<8x128xf32>
    %40 = arith.mulf %38, %39 : vector<8x128xf32>
    %41 = vector.broadcast %6 : vector<1x128xf32> to vector<8x128xf32>
    %42 = arith.addf %40, %41 : vector<8x128xf32>
    %cst_19 = arith.constant 0.000000e+00 : f32
    %43 = vector.broadcast %cst_19 : f32 to vector<8x128xf32>
    %44 = arith.maximumf %42, %43 : vector<8x128xf32>
    %cst_20 = arith.constant dense<0.000000e+00> : vector<8x128xf32>
    %45 = tpu.matmul %44, %2, %cst_20 {dimension_numbers = #tpu.dot_dimension_numbers<[1], [0], [0], [1], [0, 0, 1, 1], [], []>} : vector<8x128xf32>, vector<128x128xf32>, vector<8x128xf32> -> vector<8x128xf32>
    %46 = vector.broadcast %7 : vector<1x128xf32> to vector<8x128xf32>
    %47 = arith.addf %45, %46 : vector<8x128xf32>
    %48 = tpu.iota {dimensions = array<i32: 1>} : vector<8x128xi32>
    %c32_i32_21 = arith.constant 32 : i32
    %49 = vector.broadcast %c32_i32_21 : i32 to vector<8x128xi32>
    %50 = arith.cmpi slt, %48, %49 : vector<8x128xi32>
    %cst_22 = arith.constant 0.000000e+00 : f32
    %51 = vector.broadcast %cst_22 : f32 to vector<8x128xf32>
    %52 = arith.select %50, %47, %51 : vector<8x128xi1>, vector<8x128xf32>
    %cst_23 = arith.constant dense<0.000000e+00> : vector<8xf32>
    %53 = vector.multi_reduction <add>, %52, %cst_23 [1] : vector<8x128xf32> to vector<8xf32>
    %54 = vector.shape_cast %53 : vector<8xf32> to vector<8x1xf32>
    %cst_24 = arith.constant 3.125000e-02 : f32
    %55 = vector.broadcast %cst_24 : f32 to vector<8x1xf32>
    %56 = arith.mulf %54, %55 : vector<8x1xf32>
    %57 = vector.broadcast %56 : vector<8x1xf32> to vector<8x128xf32>
    %58 = arith.subf %47, %57 : vector<8x128xf32>
    %cst_25 = arith.constant 0.000000e+00 : f32
    %59 = vector.broadcast %cst_25 : f32 to vector<8x128xf32>
    %60 = arith.select %50, %58, %59 : vector<8x128xi1>, vector<8x128xf32>
    %61 = arith.mulf %60, %60 : vector<8x128xf32>
    %cst_26 = arith.constant dense<0.000000e+00> : vector<8xf32>
    %62 = vector.multi_reduction <add>, %61, %cst_26 [1] : vector<8x128xf32> to vector<8xf32>
    %63 = vector.shape_cast %62 : vector<8xf32> to vector<8x1xf32>
    %cst_27 = arith.constant 3.125000e-02 : f32
    %64 = vector.broadcast %cst_27 : f32 to vector<8x1xf32>
    %65 = arith.mulf %63, %64 : vector<8x1xf32>
    %cst_28 = arith.constant 9.99999974E-6 : f32
    %66 = vector.broadcast %cst_28 : f32 to vector<8x1xf32>
    %67 = arith.addf %65, %66 : vector<8x1xf32>
    %68 = math.rsqrt %67 : vector<8x1xf32>
    %69 = vector.broadcast %56 : vector<8x1xf32> to vector<8x128xf32>
    %70 = arith.subf %47, %69 : vector<8x128xf32>
    %71 = vector.broadcast %68 : vector<8x1xf32> to vector<8x128xf32>
    %72 = arith.mulf %70, %71 : vector<8x128xf32>
    %73 = vector.broadcast %8 : vector<1x128xf32> to vector<8x128xf32>
    %74 = arith.mulf %72, %73 : vector<8x128xf32>
    %75 = vector.broadcast %9 : vector<1x128xf32> to vector<8x128xf32>
    %76 = arith.addf %74, %75 : vector<8x128xf32>
    %cst_29 = arith.constant 0.000000e+00 : f32
    %77 = vector.broadcast %cst_29 : f32 to vector<8x128xf32>
    %78 = arith.maximumf %76, %77 : vector<8x128xf32>
    %cst_30 = arith.constant dense<0.000000e+00> : vector<8x128xf32>
    %79 = tpu.matmul %78, %3, %cst_30 {dimension_numbers = #tpu.dot_dimension_numbers<[1], [0], [0], [1], [0, 0, 1, 1], [], []>} : vector<8x128xf32>, vector<128x128xf32>, vector<8x128xf32> -> vector<8x128xf32>
    %80 = vector.broadcast %10 : vector<1x128xf32> to vector<8x128xf32>
    %81 = arith.addf %79, %80 : vector<8x128xf32>
    %82 = math.tanh %81 : vector<8x128xf32>
    %c0_31 = arith.constant 0 : index
    %c0_32 = arith.constant 0 : index
    %83 = vector.load %arg3[%c0_31, %c0_32] : memref<8x128xf32, #tpu.memory_space<vmem>>, vector<8x128xf32>
    tpu.vector_store %arg3[%c0_31, %c0_32], %82 {strides = array<i32>} : memref<8x128xf32, #tpu.memory_space<vmem>>, vector<8x128xf32>,
    return
  }
  func.func @transform_0(%arg0: i32) -> (i32, i32) {
    %c0_i32 = arith.constant 0 : i32
    %c0_i32_0 = arith.constant 0 : i32
    return %arg0, %c0_i32 : i32, i32
  }
  func.func @transform_1(%arg0: i32) -> (i32, i32) {
    %c0_i32 = arith.constant 0 : i32
    %c0_i32_0 = arith.constant 0 : i32
    %c0_i32_1 = arith.constant 0 : i32
    return %c0_i32, %c0_i32_0 : i32, i32
  }
  func.func @transform_2(%arg0: i32) -> (i32, i32) {
    %c0_i32 = arith.constant 0 : i32
    %c0_i32_0 = arith.constant 0 : i32
    return %arg0, %c0_i32 : i32, i32
  }
}

</mosaic_0001>

<bundles_post_ra>
// kernel: actor_forward.1
= control target key start
LH: loop header
LB: loop body
LE: loop exit
PB: predicated region body
PF: predicated region fallthrough
CT: control target
= control target key end

     0   :  { %7 = vsyncpa [#allocation3], 0  ;;  %s682_s0 = inlined_call_operand.hbm [shape: f32[8,16], index: 0, kind: input, shape index: {}]   ;;  %s683_s1 = inlined_call_operand.hbm [shape: f32[280,128], index: 1, kind: input, shape index: {}]   ;;  %s684_s2 = inlined_call_operand.vmem [shape: f32[8,128], index: 2, kind: output, shape index: {}]  }
   0x1   :  { %8 = vsyncpa [#allocation5], 0  ;;  %s598_s9 = smov [#allocation2]   ;;  %s599_s11 = smov [#allocation4]  }
   0x2   :  { %s15_s10 = sshll.u32 %s598_s9, 4  ;;  %s24_s12 = sshll.u32 %s599_s11, 4  ;;  %s16_s10 = int_to_ptr.vmem [resolvable:$true] %s15_s10  ;;  %s620_s12 = int_to_ptr.vmem [resolvable:$true] %s24_s12 }
   0x3   :  { %s550_s15 = scalar_lea.hbm %s682_s0, 128 }
   0x4   :  { %p551_p0 = scmp.ne.s32.totalorder %s682_s0, %s550_s15  ;;  %p554_p1 = scmp.lt.u32.totalorder %s550_s15, %s682_s0 }
   0x6   :  { %p556_p2 = pnand %p554_p1, %p551_p0 }
   0x8   :  { %559 = shalt.err (!%p556_p2)
}
   0x9   :  { %s560_s20 = scalar_lea.vmem %s16_s10, 128  ;;  %p565_p4 = scmp.lt.s32.totalorder %s16_s10, %s16_s10 }
   0xa   :  { %p561_p3 = scmp.ne.s32.totalorder %s16_s10, %s560_s20  ;;  %p566_p5 = scmp.lt.s32.totalorder %s560_s20, %s560_s20 }
   0xc   :  { %p567_p6 = por %p566_p5, %p565_p4 }
   0xe   :  { %p568_p7 = pnand %p567_p6, %p561_p3 }
  0x10   :  { %571 = shalt.err (!%p568_p7)
}
  0x11   :  { %18 = dma.hbm_to_vmem [thread:$0]  %s682_s0, 128, %s16_s10, [#allocation3]  }
  0x12   :  { %s572_s25 = scalar_lea.hbm %s683_s1, 4480 }
  0x13   :  { %p573_p8 = scmp.ne.s32.totalorder %s683_s1, %s572_s25  ;;  %p576_p9 = scmp.lt.u32.totalorder %s572_s25, %s683_s1 }
  0x15   :  { %p578_p10 = pnand %p576_p9, %p573_p8 }
  0x17   :  { %581 = shalt.err (!%p578_p10)
}
  0x18   :  { %s582_s30 = scalar_lea.vmem %s620_s12, 4480  ;;  %p587_p12 = scmp.lt.s32.totalorder %s620_s12, %s620_s12 }
  0x19   :  { %p583_p11 = scmp.ne.s32.totalorder %s620_s12, %s582_s30  ;;  %p588_p13 = scmp.lt.s32.totalorder %s582_s30, %s582_s30 }
  0x1b   :  { %p589_p0 = por %p588_p13, %p587_p12 }
  0x1d   :  { %p590_p1 = pnand %p589_p0, %p583_p11 }
  0x1f   :  { %593 = shalt.err (!%p590_p1)
}
  0x20   :  { %s600_s0 = smov 128   ;;  %s601_s3 = smov 8  }
  0x21   :  { %30 = dma.hbm_to_vmem [thread:$0]  %s683_s1, 4480, %s620_s12, [#allocation5], %s600_s0, %s600_s0, %s601_s3  }
  0x22   :  { %594 = dma.done.wait [#allocation3], 128  }
  0x23   :  { %595 = vsyncadd [#allocation3], 4294967168 }
  0x24   :  { %596 = dma.done.wait [#allocation5], 4480  }
  0x25   :  { %597 = vsyncadd [#allocation5], 4294962816  ;;  %v602_v0 = vmov 0.0|0.0   ;;  %vm603_vm0 = vmmov 0   ;;  %v604_v1 = vmov 0.0   ;;  %v38_v2 = vld [vmem:[#allocation4] sm:$0xff]  ;;  %v157_v6 = vlaneseq }
  0x26   :  { %486 = vmatprep.subr.bf16.mxu0 %v602_v0  ;;  %413 = vmatprep.mubr.msk.f32.mxu0 %vm603_vm0, %v604_v1  ;;  %v39_v3 = vld [vmem:[#allocation4 + $0x8] sm:$0xff]  ;;  %v37_v5 = vld [vmem:[#allocation2] sm:$0xff]  ;;  %vm83_vm1 = vcmask 130048   ;;  %v364_v8 = vld [vmem:[#allocation4 + $0x110] ss:$0 sm:$0xff] }
  0x27   :  { %489 = vmatprep.subr.bf16.mxu1 %v602_v0  ;;  %448 = vmatprep.mubr.msk.f32.mxu1 %vm603_vm0, %v604_v1  ;;  %v487_v4 = vpack.c.bf16 %v39_v3, %v38_v2  ;;  %v654_v7 = vand.u32 127, %v157_v6  ;;  %v40_v13 = vld [vmem:[#allocation4 + $0x10] sm:$0xff]  ;;  %v41_v14 = vld [vmem:[#allocation4 + $0x18] sm:$0xff]  ;;  %v42_v15 = vld [vmem:[#allocation4 + $0x20] sm:$0xff] }
  0x28   :  { %v490_v16 = vpack.c.bf16 %v41_v14, %v40_v13  ;;  %v43_v17 = vld [vmem:[#allocation4 + $0x28] sm:$0xff]  ;;  %v44_v24 = vld [vmem:[#allocation4 + $0x30] sm:$0xff]  ;;  %v45_v25 = vld [vmem:[#allocation4 + $0x38] sm:$0xff] }
  0x29   :  { %488 = vmatpush3.bf16.msra.mxu0 %v487_v4  ;;  %vm159_vm2 = vcmp.lt.s32.totalorder %v654_v7, 32  ;;  %v493_v18 = vpack.c.bf16 %v43_v17, %v42_v15  ;;  %v496_v26 = vpack.c.bf16 %v45_v25, %v44_v24  ;;  %v46_v27 = vld [vmem:[#allocation4 + $0x40] sm:$0xff]  ;;  %v47_v28 = vld [vmem:[#allocation4 + $0x48] sm:$0xff]  ;;  %v48_v30 = vld [vmem:[#allocation4 + $0x50] sm:$0xff] }
  0x2a   :  { %513 = vmatprep.subr.bf16.mxu0 %v602_v0  ;;  %491 = vmatpush3.bf16.msra.mxu1 %v490_v16  ;;  %v499_v29 = vpack.c.bf16 %v47_v28, %v46_v27  ;;  %v49_v31 = vld [vmem:[#allocation4 + $0x58] sm:$0xff]  ;;  %v50_v33 = vld [vmem:[#allocation4 + $0x60] sm:$0xff]  ;;  %v51_v34 = vld [vmem:[#allocation4 + $0x68] sm:$0xff] }
  0x2b   :  { %492 = vmatprep.subr.bf16.mxu1 %v602_v0  ;;  %v502_v32 = vpack.c.bf16 %v49_v31, %v48_v30  ;;  %v505_v35 = vpack.c.bf16 %v51_v34, %v50_v33  ;;  %v52_v36 = vld [vmem:[#allocation4 + $0x70] sm:$0xff]  ;;  %v53_v37 = vld [vmem:[#allocation4 + $0x78] sm:$0xff]  ;;  %v54_v39 = vld [vmem:[#allocation4 + $0x80] sm:$0xff] }
  0x2c   :  { %414 = vmatmul.mubr.msk.f32.vlgmr.msra.gmra.mrb[0].mxu0 %vm83_vm1, %v37_v5  ;;  %v508_v38 = vpack.c.bf16 %v53_v37, %v52_v36  ;;  %v55_v40 = vld [vmem:[#allocation4 + $0x88] sm:$0xff]  ;;  %v366_v46 = vld [vmem:[#allocation4 + $0x111] ss:$0 sm:$0xff]  ;;  %v367_v48 = vld [vmem:[#allocation4 + $0x112] ss:$0 sm:$0xff] }
  0x2d   :  { %483 = vmatprep.mubr.msk.f32.mxu0 %vm603_vm0, %v604_v1  ;;  %v511_v41 = vpack.c.bf16 %v55_v40, %v54_v39  ;;  %v368_v52 = vld [vmem:[#allocation4 + $0x113] ss:$0 sm:$0xff]  ;;  %v57_v58 = vld [vmem:[#allocation4 + $0x98] sm:$0xff]  ;;  %v58_v59 = vld [vmem:[#allocation4 + $0xa0] sm:$0xff] }
  0x2e   :  { %494 = vmatpush3.bf16.msra.mxu1 %v493_v18  ;;  %v56_v57 = vld [vmem:[#allocation4 + $0x90] sm:$0xff]  ;;  %v59_v61 = vld [vmem:[#allocation4 + $0xa8] sm:$0xff]  ;;  %v61_v6 = vld [vmem:[#allocation4 + $0xb8] sm:$0xff] }
  0x2f   :  { %495 = vmatprep.subr.bf16.mxu1 %v602_v0  ;;  %v514_v60 = vpack.c.bf16 %v57_v58, %v56_v57  ;;  %v517_v62 = vpack.c.bf16 %v59_v61, %v58_v59  ;;  %v60_v5 = vld [vmem:[#allocation4 + $0xb0] sm:$0xff]  ;;  %v65_v13 = vld [vmem:[#allocation4 + $0xd8] sm:$0xff]  ;;  %v66_v7 = vld [vmem:[#allocation4 + $0xe0] sm:$0xff] }
  0x30   :  { %v67_v15 = vld [vmem:[#allocation4 + $0xe8] sm:$0xff]  ;;  %v68_v17 = vld [vmem:[#allocation4 + $0xf0] sm:$0xff]  ;;  %v69_v18 = vld [vmem:[#allocation4 + $0xf8] sm:$0xff] }
  0x31   :  { %515 = vmatpush3.bf16.msra.mxu0 %v514_v60  ;;  %v529_v16 = vpack.c.bf16 %v67_v15, %v66_v7  ;;  %v369_v27 = vld [vmem:[#allocation4 + $0x114] ss:$0 sm:$0xff]  ;;  %v371_v33 = vld [vmem:[#allocation4 + $0x116] ss:$0 sm:$0xff] }
  0x32   :  { %497 = vmatpush3.bf16.msra.mxu1 %v496_v26  ;;  %516 = vmatprep.subr.bf16.mxu0 %v602_v0 }
  0x33   :  { %498 = vmatprep.subr.bf16.mxu1 %v602_v0 }
  0x35   :  { %518 = vmatpush3.bf16.msra.mxu0 %v517_v62 }
  0x36   :  { %500 = vmatpush3.bf16.msra.mxu1 %v499_v29  ;;  %519 = vmatprep.subr.bf16.mxu0 %v602_v0  ;;  %v370_v29 = vld [vmem:[#allocation4 + $0x115] ss:$0 sm:$0xff] }
  0x37   :  { %501 = vmatprep.subr.bf16.mxu1 %v602_v0 }
  0x3a   :  { %503 = vmatpush3.bf16.msra.mxu1 %v502_v32 }
  0x3b   :  { %504 = vmatprep.subr.bf16.mxu1 %v602_v0 }
  0x3e   :  { %506 = vmatpush3.bf16.msra.mxu1 %v505_v35 }
  0x3f   :  { %507 = vmatprep.subr.bf16.mxu1 %v602_v0 }
  0x42   :  { %509 = vmatpush3.bf16.msra.mxu1 %v508_v38 }
  0x43   :  { %510 = vmatprep.subr.bf16.mxu1 %v602_v0 }
  0x46   :  { %512 = vmatpush3.bf16.msra.mxu1 %v511_v41 }
  0xff   :  { %v153_v9 = vpop.f32.mrb[0].mxu0 }
 0x100   :  { %v154_v10 = vadd.f32 %v364_v8, %v153_v9  ;;  %v415_v11 = vpop.f32.mrb[1].mxu0  ;;  %v520_v8 = vpack.c.bf16 %v61_v6, %v60_v5  ;;  %v62_v9 = vld [vmem:[#allocation4 + $0xc0] sm:$0xff] }
 0x102   :  { %v160_v12 = vsel %vm159_vm2, %v154_v10, 0.0  ;;  %521 = vmatpush3.bf16.msra.mxu0 %v520_v8 }
 0x103   :  { %161 = vadd.xlane.f32.xlu0 %v160_v12  ;;  %522 = vmatprep.subr.bf16.mxu0 %v602_v0  ;;  %v64_v12 = vld [vmem:[#allocation4 + $0xd0] sm:$0xff] }
 0x104   :  { %v526_v14 = vpack.c.bf16 %v65_v13, %v64_v12 }
 0x190   :  { %v162_v19 = vpop.xlane.xlu0 %161 }
 0x191   :  { %v163_v20 = vmul.f32 0.03125, %v162_v19  ;;  %v532_v19 = vpack.c.bf16 %v69_v18, %v68_v17 }
 0x193   :  { %v164_v21 = vsub.f32 %v154_v10, %v163_v20  ;;  %v63_v10 = vld [vmem:[#allocation4 + $0xc8] sm:$0xff]  ;;  %v70_v20 = vld [vmem:[#allocation4 + $0x100] sm:$0xff] }
 0x194   :  { %v523_v11 = vpack.c.bf16 %v63_v10, %v62_v9 }
 0x195   :  { %v165_v22 = vsel %vm159_vm2, %v164_v21, 0.0 }
 0x196   :  { %v166_v23 = vmul.f32 %v165_v22, %v165_v22  ;;  %524 = vmatpush3.bf16.msra.mxu0 %v523_v11 }
 0x197   :  { %525 = vmatprep.subr.bf16.mxu0 %v602_v0 }
 0x198   :  { %167 = vadd.xlane.f32.xlu0 %v166_v23 }
 0x19a   :  { %527 = vmatpush3.bf16.msra.mxu0 %v526_v14 }
 0x19b   :  { %528 = vmatprep.subr.bf16.mxu0 %v602_v0 }
 0x19e   :  { %530 = vmatpush3.bf16.msra.mxu0 %v529_v16 }
 0x19f   :  { %531 = vmatprep.subr.bf16.mxu0 %v602_v0 }
 0x1a2   :  { %533 = vmatpush3.bf16.msra.mxu0 %v532_v19 }
 0x1a3   :  { %534 = vmatprep.subr.bf16.mxu0 %v602_v0 }
 0x225   :  { %v168_v42 = vpop.xlane.xlu0 %167 }
 0x226   :  { %v169_v43 = vmul.f32 0.03125, %v168_v42 }
 0x228   :  { %v170_v44 = vadd.f32 1e-05, %v169_v43 }
 0x22a   :  { %544 = vrsqrt.f32 %v170_v44 }
 0x234   :  { %v545_v45 = vpop.eup %544 }
 0x235   :  { %v172_v47 = vmul.f32 %v545_v45, %v164_v21  ;;  %v71_v21 = vld [vmem:[#allocation4 + $0x108] sm:$0xff] }
 0x236   :  { %v535_v22 = vpack.c.bf16 %v71_v21, %v70_v20 }
 0x237   :  { %v177_v49 = vmul.f32 %v366_v46, %v172_v47 }
 0x238   :  { %536 = vmatpush3.bf16.msra.mxu0 %v535_v22 }
 0x239   :  { %v182_v50 = vadd.f32 %v367_v48, %v177_v49 }
 0x23b   :  { %v183_v51 = vmax.f32 %v182_v50, 0.0 }
 0x23d   :  { %449 = vmatmul.mubr.f32.vlgmr.msra.gmra.mrb[0].mxu1 %v183_v51 }
 0x310   :  { %v254_v53 = vpop.f32.mrb[0].mxu1 }
 0x311   :  { %v255_v54 = vadd.f32 %v368_v52, %v254_v53  ;;  %v450_v55 = vpop.f32.mrb[1].mxu1 }
 0x313   :  { %v258_v56 = vsel %vm159_vm2, %v255_v54, 0.0 }
 0x314   :  { %259 = vadd.xlane.f32.xlu1 %v258_v56 }
 0x3a1   :  { %v260_v63 = vpop.xlane.xlu1 %259 }
 0x3a2   :  { %v261_v1 = vmul.f32 0.03125, %v260_v63 }
 0x3a4   :  { %v262_v2 = vsub.f32 %v255_v54, %v261_v1 }
 0x3a6   :  { %v263_v3 = vsel %vm159_vm2, %v262_v2, 0.0 }
 0x3a7   :  { %v264_v4 = vmul.f32 %v263_v3, %v263_v3 }
 0x3a9   :  { %265 = vadd.xlane.f32.xlu1 %v264_v4 }
 0x436   :  { %v266_v23 = vpop.xlane.xlu1 %265 }
 0x437   :  { %v267_v24 = vmul.f32 0.03125, %v266_v23 }
 0x439   :  { %v268_v25 = vadd.f32 1e-05, %v267_v24 }
 0x43b   :  { %546 = vrsqrt.f32 %v268_v25 }
 0x445   :  { %v547_v26 = vpop.eup %546 }
 0x446   :  { %v270_v28 = vmul.f32 %v547_v26, %v262_v2 }
 0x448   :  { %v275_v30 = vmul.f32 %v369_v27, %v270_v28 }
 0x44a   :  { %v280_v31 = vadd.f32 %v370_v29, %v275_v30 }
 0x44c   :  { %v281_v32 = vmax.f32 %v280_v31, 0.0 }
 0x44e   :  { %484 = vmatmul.mubr.f32.vlgmr.msra.gmra.mrb[2].mxu0 %v281_v32 }
 0x521   :  { %v352_v34 = vpop.f32.mrb[2].mxu0 }
 0x522   :  { %v353_v35 = vadd.f32 %v371_v33, %v352_v34  ;;  %v485_v36 = vpop.f32.mrb[3].mxu0 }
 0x524   :  { %548 = vtanh.f32 %v353_v35 }
 0x52e   :  { %v549_v37 = vpop.eup %548 }
 0x52f   :  { %357 = vst [vmem:[%s684_s2] sm:$0xff] %v549_v37 }
 0x530   :  { %362 = vsyncpa [#allocation3], 1 }
 0x531   :  { %363 = vsyncpa [#allocation5], 1 }

</bundles_post_ra>
